<compile_context>
chip_gen: v7x
topology: tpu7x:2x2x1
jax: 0.10.0
libtpu: 0.0.40
codegen_flags: <defaults>
</compile_context>

<pallas_src>
import jax
import jax.numpy as jnp
import numpy as np
from jax.experimental import pallas as pl
from jax.experimental.pallas import tpu as pltpu


def _round_up(x, m):
    return ((x + m - 1) // m) * m


def _make_sid_kernel(L_total, TL, num_l_tiles):
    """Build the SID kernel body with the static tiling baked in."""
    # Rows j < L_rem of an L tile are always valid; rows j >= L_rem are valid
    # only when the tile is not the last one along L.
    L_rem = L_total - (num_l_tiles - 1) * TL
    inv_L = 1.0 / L_total
    inv_Lm1 = 1.0 / (L_total - 1) if L_total > 1 else float("nan")  # torch.var L==1 -> NaN

    def kernel(x_ref, w_ref, b_ref, o_ref, max_acc, min_acc, sum_acc, sq_acc):
        # x_ref: (TL, C, TR)  w_ref: (4, D, C)  b_ref: (D, 1)  o_ref: (D, TR)
        # scratch accumulators: (C, TR) f32 each
        l = pl.program_id(1)
        not_last = l < pl.num_programs(1) - 1  # hoisted scalar mask predicate

        # ---- local reduction over this tile's TL rows (registers, VPU) -----
        x0 = x_ref[0].astype(jnp.float32)              # row 0 is always valid
        loc_max = x0
        loc_min = x0
        loc_sum = x0
        loc_sq = x0 * x0
        for j in range(1, TL):                          # TL is small & static
            xj = x_ref[j].astype(jnp.float32)
            if j >= L_rem:                              # only last L tile masks
                xj_max = jnp.where(not_last, xj, -jnp.inf)
                xj_min = jnp.where(not_last, xj, jnp.inf)
                xj_sum = jnp.where(not_last, xj, 0.0)
            else:
                xj_max = xj_min = xj_sum = xj
            loc_max = jnp.maximum(loc_max, xj_max)
            loc_min = jnp.minimum(loc_min, xj_min)
            loc_sum = loc_sum + xj_sum
            loc_sq = loc_sq + xj_sum * xj_sum

        # ---- merge into persistent VMEM accumulators ------------------------
        @pl.when(l == 0)
        def _init():
            max_acc[...] = loc_max
            min_acc[...] = loc_min
            sum_acc[...] = loc_sum
            sq_acc[...] = loc_sq

        @pl.when(l != 0)
        def _merge():
            max_acc[...] = jnp.maximum(max_acc[...], loc_max)
            min_acc[...] = jnp.minimum(min_acc[...], loc_min)
            sum_acc[...] = sum_acc[...] + loc_sum
            sq_acc[...] = sq_acc[...] + loc_sq

        # ---- finalize: stats -> 4 split GEMMs -> bias -> lane-dense store ---
        @pl.when(l == pl.num_programs(1) - 1)
        def _finalize():
            x_sum = sum_acc[...]
            x_avg = x_sum * inv_L
            # one-pass unbiased variance: (sum(x^2) - L*mean^2) / (L - 1)
            x_var = (sq_acc[...] - x_sum * x_avg) * inv_Lm1
            acc = jnp.dot(w_ref[0].astype(jnp.float32), max_acc[...],
                          preferred_element_type=jnp.float32)
            acc = acc + jnp.dot(w_ref[1].astype(jnp.float32), min_acc[...],
                                preferred_element_type=jnp.float32)
            acc = acc + jnp.dot(w_ref[2].astype(jnp.float32), x_avg,
                                preferred_element_type=jnp.float32)
            acc = acc + jnp.dot(w_ref[3].astype(jnp.float32), x_var,
                                preferred_element_type=jnp.float32)
            acc = acc + b_ref[...].astype(jnp.float32)   # (D,1) broadcast over lanes
            o_ref[...] = acc.astype(o_ref.dtype)

    return kernel


def sid_forward(inp, weight, bias, patch_size=8):
    """inp: (b, c, h, w) NCHW. weight: (D, 4*c), bias: (D,). Returns (b, P*P, D)."""
    b, c, h, w = inp.shape
    P = patch_size
    assert h % P == 0 and w % P == 0, f"Input ({h}x{w}) not divisible by patch {P}"
    N_h, N_w = h // P, w // P
    n = P * P
    L = N_h * N_w
    D = weight.shape[0]
    R = b * n

    # Layout glue: NCHW -> (L, C, R) with R = (b, ph, pw) on the lane axis.
    # Mirrors torch: reshape(b,c,P,N_h,P,N_w) (P outer, N inner split).
    x = inp.reshape(b, c, P, N_h, P, N_w)
    x = jnp.transpose(x, (3, 5, 1, 0, 2, 4))      # (N_h, N_w, c, b, P, P)
    x = x.reshape(L, c, R)

    # Lane tiling over R: multiples of 128, up to 1024 lanes per grid step.
    TR = min(1024, _round_up(R, 128))
    R_pad = _round_up(R, TR)
    if R_pad != R:
        x = jnp.pad(x, ((0, 0), (0, 0), (0, R_pad - R)))

    # Reduction tiling over L: keep x block <= ~2 MiB and the unroll short.
    itemsize = int(np.dtype(inp.dtype).itemsize)
    row_bytes = c * TR * itemsize
    TL = max(1, min(L, 16, (2 * 1024 * 1024) // max(row_bytes, 1)))
    num_l = pl.cdiv(L, TL)
    L_pad = num_l * TL
    if L_pad != L:
        x = jnp.pad(x, ((0, L_pad - L), (0, 0), (0, 0)))  # padded rows are masked

    grid = (R_pad // TR, num_l)

    # torch Linear weight (D, 4c) uses feature index ch*4 + stat -> (4, D, c),
    # stat order 0=max, 1=min, 2=avg, 3=var (torch.cat order in method_SID).
    w_sdc = jnp.transpose(weight.reshape(D, c, 4), (2, 0, 1))
    bias_col = bias.reshape(D, 1)

    cost = pl.CostEstimate(
        flops=int(4 * L * c * R_pad + 2 * 4 * c * D * R_pad),
        transcendentals=0,
        bytes_accessed=int(L_pad * c * R_pad * itemsize + D * R_pad * itemsize
                           + 4 * D * c * 4 + D * 4),
    )

    kernel = _make_sid_kernel(L, TL, num_l)

    out = pl.pallas_call(
        kernel,
        out_shape=jax.ShapeDtypeStruct((D, R_pad), inp.dtype),
        grid=grid,
        in_specs=[
            pl.BlockSpec((TL, c, TR), lambda i, l: (l, 0, i)),
            pl.BlockSpec((4, D, c), lambda i, l: (0, 0, 0)),
            pl.BlockSpec((D, 1), lambda i, l: (0, 0)),
        ],
        out_specs=pl.BlockSpec((D, TR), lambda i, l: (0, i)),
        scratch_shapes=[pltpu.VMEM((c, TR), jnp.float32)] * 4,
        compiler_params=pltpu.CompilerParams(
            dimension_semantics=("parallel", "arbitrary")),
        cost_estimate=cost,
    )(x, w_sdc, bias_col)

    out = out[:, :R]                      # (D, R), lane-dense kernel output
    return out.T.reshape(b, n, D)


def sid_reference(inp, weight, bias, patch_size=8):
    """Pure-JAX reference mirroring the PyTorch forward exactly (two-pass var)."""
    b, c, h, w = inp.shape
    P = patch_size
    N_h, N_w = h // P, w // P
    x = inp.reshape(b, c, P, N_h, P, N_w)
    x = jnp.transpose(x, (0, 1, 2, 4, 3, 5)).reshape(b, c, P * P, N_h * N_w)
    x_max = x.max(-1)
    x_min = x.min(-1)
    x_avg = x.mean(-1)
    x_var = ((x - x_avg[..., None]) ** 2).sum(-1) / (N_h * N_w - 1)
    stats = jnp.stack([x_max, x_min, x_avg, x_var], axis=-1)          # (b,c,n,4)
    feat = jnp.transpose(stats, (0, 2, 1, 3)).reshape(b, P * P, c * 4)
    return feat @ weight.T + bias


if __name__ == "__main__":
    patch_size = 8
    b, c = 2, 4                      # input_dim = c = 4
    output_dim = 32

    key = jax.random.PRNGKey(0)
    k_x, k_w, k_b, k_x2 = jax.random.split(key, 4)
    # Deterministic synthetic Linear params (shape matches nn.Linear(4*c, output_dim))
    bound = 1.0 / np.sqrt(4 * c)
    weight = jax.random.uniform(k_w, (output_dim, 4 * c), jnp.float32, -bound, bound)
    bias = jax.random.uniform(k_b, (output_dim,), jnp.float32, -bound, bound)

    # --- main case: (2, 4, 16, 16) -> L = 4 (single reduction step) ---------
    x = jax.random.normal(k_x, (b, c, 16, 16), dtype=jnp.float32)
    out = sid_forward(x, weight, bias, patch_size=patch_size)
    out = jax.block_until_ready(out)
    ref = sid_reference(x, weight, bias, patch_size=patch_size)
    np.testing.assert_allclose(np.asarray(out), np.asarray(ref), rtol=1e-4, atol=1e-4)

    # --- extra small check: (2, 4, 40, 40) -> L = 25, exercises the tiled
    #     (multi-step, masked) reduction path ---------------------------------
    x2 = jax.random.normal(k_x2, (b, c, 40, 40), dtype=jnp.float32)
    out2 = jax.block_until_ready(sid_forward(x2, weight, bias, patch_size=patch_size))
    ref2 = sid_reference(x2, weight, bias, patch_size=patch_size)
    np.testing.assert_allclose(np.asarray(out2), np.asarray(ref2), rtol=1e-4, atol=1e-4)

    print("KERNEL_OK")
</pallas_src>

<mosaic_0001>
module attributes {stable_mosaic.version = 11 : i64} {
  func.func @kernel(%arg0: i32, %arg1: i32, %arg2: memref<4x4x128xf32, #tpu.memory_space<vmem>>, %arg3: memref<4x32x4xf32, #tpu.memory_space<vmem>>, %arg4: memref<32x1xf32, #tpu.memory_space<vmem>>, %arg5: memref<32x128xf32, #tpu.memory_space<vmem>>, %arg6: memref<4x128xf32, #tpu.memory_space<vmem>>, %arg7: memref<4x128xf32, #tpu.memory_space<vmem>>, %arg8: memref<4x128xf32, #tpu.memory_space<vmem>>, %arg9: memref<4x128xf32, #tpu.memory_space<vmem>>) attributes {dimension_semantics = [#tpu.dimension_semantics<parallel>, #tpu.dimension_semantics<arbitrary>], iteration_bounds = array<i64: 1, 1>, scalar_prefetch = 0 : i64, scratch_operands = 4 : i64, tpu.core_type = #tpu.core_type<tc>, window_params = [{transform_indices = @transform_0, window_bounds = array<i64: 4, 4, 128>}, {pipeline_mode = #tpu.pipeline_mode<synchronous>, transform_indices = @transform_1, window_bounds = array<i64: 4, 32, 4>}, {pipeline_mode = #tpu.pipeline_mode<synchronous>, transform_indices = @transform_2, window_bounds = array<i64: 32, 1>}, {transform_indices = @transform_3, window_bounds = array<i64: 32, 128>}]} {
    %c0 = arith.constant 0 : index
    %c0_0 = arith.constant 0 : index
    %c0_1 = arith.constant 0 : index
    %0 = vector.load %arg2[%c0, %c0_0, %c0_1] : memref<4x4x128xf32, #tpu.memory_space<vmem>>, vector<1x4x128xf32>
    %1 = vector.shape_cast %0 : vector<1x4x128xf32> to vector<4x128xf32>
    %2 = arith.mulf %1, %1 : vector<4x128xf32>
    %c1 = arith.constant 1 : index
    %c0_2 = arith.constant 0 : index
    %c0_3 = arith.constant 0 : index
    %3 = vector.load %arg2[%c1, %c0_2, %c0_3] : memref<4x4x128xf32, #tpu.memory_space<vmem>>, vector<1x4x128xf32>
    %4 = vector.shape_cast %3 : vector<1x4x128xf32> to vector<4x128xf32>
    %5 = arith.maximumf %1, %4 : vector<4x128xf32>
    %6 = arith.minimumf %1, %4 : vector<4x128xf32>
    %7 = arith.addf %1, %4 : vector<4x128xf32>
    %8 = arith.mulf %4, %4 : vector<4x128xf32>
    %9 = arith.addf %2, %8 : vector<4x128xf32>
    %c2 = arith.constant 2 : index
    %c0_4 = arith.constant 0 : index
    %c0_5 = arith.constant 0 : index
    %10 = vector.load %arg2[%c2, %c0_4, %c0_5] : memref<4x4x128xf32, #tpu.memory_space<vmem>>, vector<1x4x128xf32>
    %11 = vector.shape_cast %10 : vector<1x4x128xf32> to vector<4x128xf32>
    %12 = arith.maximumf %5, %11 : vector<4x128xf32>
    %13 = arith.minimumf %6, %11 : vector<4x128xf32>
    %14 = arith.addf %7, %11 : vector<4x128xf32>
    %15 = arith.mulf %11, %11 : vector<4x128xf32>
    %16 = arith.addf %9, %15 : vector<4x128xf32>
    %c3 = arith.constant 3 : index
    %c0_6 = arith.constant 0 : index
    %c0_7 = arith.constant 0 : index
    %17 = vector.load %arg2[%c3, %c0_6, %c0_7] : memref<4x4x128xf32, #tpu.memory_space<vmem>>, vector<1x4x128xf32>
    %18 = vector.shape_cast %17 : vector<1x4x128xf32> to vector<4x128xf32>
    %19 = arith.maximumf %12, %18 : vector<4x128xf32>
    %20 = arith.minimumf %13, %18 : vector<4x128xf32>
    %21 = arith.addf %14, %18 : vector<4x128xf32>
    %22 = arith.mulf %18, %18 : vector<4x128xf32>
    %23 = arith.addf %16, %22 : vector<4x128xf32>
    %c0_i32 = arith.constant 0 : i32
    %24 = arith.cmpi eq, %arg1, %c0_i32 : i32
    %25 = arith.extui %24 : i1 to i32
    %c0_i32_8 = arith.constant 0 : i32
    %26 = arith.cmpi ne, %25, %c0_i32_8 : i32
    scf.if %26 {
      %c0_13 = arith.constant 0 : index
      %c0_14 = arith.constant 0 : index
      %33 = vector.load %arg6[%c0_13, %c0_14] : memref<4x128xf32, #tpu.memory_space<vmem>>, vector<4x128xf32>
      tpu.vector_store %arg6[%c0_13, %c0_14], %19 {strides = array<i32>} : memref<4x128xf32, #tpu.memory_space<vmem>>, vector<4x128xf32>,
      %c0_15 = arith.constant 0 : index
      %c0_16 = arith.constant 0 : index
      %34 = vector.load %arg7[%c0_15, %c0_16] : memref<4x128xf32, #tpu.memory_space<vmem>>, vector<4x128xf32>
      tpu.vector_store %arg7[%c0_15, %c0_16], %20 {strides = array<i32>} : memref<4x128xf32, #tpu.memory_space<vmem>>, vector<4x128xf32>,
      %c0_17 = arith.constant 0 : index
      %c0_18 = arith.constant 0 : index
      %35 = vector.load %arg8[%c0_17, %c0_18] : memref<4x128xf32, #tpu.memory_space<vmem>>, vector<4x128xf32>
      tpu.vector_store %arg8[%c0_17, %c0_18], %21 {strides = array<i32>} : memref<4x128xf32, #tpu.memory_space<vmem>>, vector<4x128xf32>,
      %c0_19 = arith.constant 0 : index
      %c0_20 = arith.constant 0 : index
      %36 = vector.load %arg9[%c0_19, %c0_20] : memref<4x128xf32, #tpu.memory_space<vmem>>, vector<4x128xf32>
      tpu.vector_store %arg9[%c0_19, %c0_20], %23 {strides = array<i32>} : memref<4x128xf32, #tpu.memory_space<vmem>>, vector<4x128xf32>,
    } else {
    }
    %c0_i32_9 = arith.constant 0 : i32
    %27 = arith.cmpi ne, %arg1, %c0_i32_9 : i32
    %28 = arith.extui %27 : i1 to i32
    %c0_i32_10 = arith.constant 0 : i32
    %29 = arith.cmpi ne, %28, %c0_i32_10 : i32
    scf.if %29 {
      %c0_13 = arith.constant 0 : index
      %c0_14 = arith.constant 0 : index
      %33 = vector.load %arg6[%c0_13, %c0_14] : memref<4x128xf32, #tpu.memory_space<vmem>>, vector<4x128xf32>
      %34 = arith.maximumf %33, %19 : vector<4x128xf32>
      %c0_15 = arith.constant 0 : index
      %c0_16 = arith.constant 0 : index
      %35 = vector.load %arg6[%c0_15, %c0_16] : memref<4x128xf32, #tpu.memory_space<vmem>>, vector<4x128xf32>
      tpu.vector_store %arg6[%c0_15, %c0_16], %34 {strides = array<i32>} : memref<4x128xf32, #tpu.memory_space<vmem>>, vector<4x128xf32>,
      %c0_17 = arith.constant 0 : index
      %c0_18 = arith.constant 0 : index
      %36 = vector.load %arg7[%c0_17, %c0_18] : memref<4x128xf32, #tpu.memory_space<vmem>>, vector<4x128xf32>
      %37 = arith.minimumf %36, %20 : vector<4x128xf32>
      %c0_19 = arith.constant 0 : index
      %c0_20 = arith.constant 0 : index
      %38 = vector.load %arg7[%c0_19, %c0_20] : memref<4x128xf32, #tpu.memory_space<vmem>>, vector<4x128xf32>
      tpu.vector_store %arg7[%c0_19, %c0_20], %37 {strides = array<i32>} : memref<4x128xf32, #tpu.memory_space<vmem>>, vector<4x128xf32>,
      %c0_21 = arith.constant 0 : index
      %c0_22 = arith.constant 0 : index
      %39 = vector.load %arg8[%c0_21, %c0_22] : memref<4x128xf32, #tpu.memory_space<vmem>>, vector<4x128xf32>
      %40 = arith.addf %39, %21 : vector<4x128xf32>
      %c0_23 = arith.constant 0 : index
      %c0_24 = arith.constant 0 : index
      %41 = vector.load %arg8[%c0_23, %c0_24] : memref<4x128xf32, #tpu.memory_space<vmem>>, vector<4x128xf32>
      tpu.vector_store %arg8[%c0_23, %c0_24], %40 {strides = array<i32>} : memref<4x128xf32, #tpu.memory_space<vmem>>, vector<4x128xf32>,
      %c0_25 = arith.constant 0 : index
      %c0_26 = arith.constant 0 : index
      %42 = vector.load %arg9[%c0_25, %c0_26] : memref<4x128xf32, #tpu.memory_space<vmem>>, vector<4x128xf32>
      %43 = arith.addf %42, %23 : vector<4x128xf32>
      %c0_27 = arith.constant 0 : index
      %c0_28 = arith.constant 0 : index
      %44 = vector.load %arg9[%c0_27, %c0_28] : memref<4x128xf32, #tpu.memory_space<vmem>>, vector<4x128xf32>
      tpu.vector_store %arg9[%c0_27, %c0_28], %43 {strides = array<i32>} : memref<4x128xf32, #tpu.memory_space<vmem>>, vector<4x128xf32>,
    } else {
    }
    %c0_i32_11 = arith.constant 0 : i32
    %30 = arith.cmpi eq, %arg1, %c0_i32_11 : i32
    %31 = arith.extui %30 : i1 to i32
    %c0_i32_12 = arith.constant 0 : i32
    %32 = arith.cmpi ne, %31, %c0_i32_12 : i32
    scf.if %32 {
      %c0_13 = arith.constant 0 : index
      %c0_14 = arith.constant 0 : index
      %33 = vector.load %arg8[%c0_13, %c0_14] : memref<4x128xf32, #tpu.memory_space<vmem>>, vector<4x128xf32>
      %cst = arith.constant 2.500000e-01 : f32
      %34 = vector.broadcast %cst : f32 to vector<4x128xf32>
      %35 = arith.mulf %33, %34 : vector<4x128xf32>
      %c0_15 = arith.constant 0 : index
      %c0_16 = arith.constant 0 : index
      %36 = vector.load %arg9[%c0_15, %c0_16] : memref<4x128xf32, #tpu.memory_space<vmem>>, vector<4x128xf32>
      %37 = arith.mulf %33, %35 : vector<4x128xf32>
      %38 = arith.subf %36, %37 : vector<4x128xf32>
      %cst_17 = arith.constant 0.333333343 : f32
      %39 = vector.broadcast %cst_17 : f32 to vector<4x128xf32>
      %40 = arith.mulf %38, %39 : vector<4x128xf32>
      %c0_18 = arith.constant 0 : index
      %c0_19 = arith.constant 0 : index
      %c0_20 = arith.constant 0 : index
      %41 = vector.load %arg3[%c0_18, %c0_19, %c0_20] : memref<4x32x4xf32, #tpu.memory_space<vmem>>, vector<1x32x4xf32>
      %42 = vector.shape_cast %41 : vector<1x32x4xf32> to vector<32x4xf32>
      %c0_21 = arith.constant 0 : index
      %c0_22 = arith.constant 0 : index
      %43 = vector.load %arg6[%c0_21, %c0_22] : memref<4x128xf32, #tpu.memory_space<vmem>>, vector<4x128xf32>
      %cst_23 = arith.constant dense<0.000000e+00> : vector<32x128xf32>
      %44 = tpu.matmul %42, %43, %cst_23 {dimension_numbers = #tpu.dot_dimension_numbers<[1], [0], [0], [1], [0, 0, 1, 1], [], []>} : vector<32x4xf32>, vector<4x128xf32>, vector<32x128xf32> -> vector<32x128xf32>
      %c1_24 = arith.constant 1 : index
      %c0_25 = arith.constant 0 : index
      %c0_26 = arith.constant 0 : index
      %45 = vector.load %arg3[%c1_24, %c0_25, %c0_26] : memref<4x32x4xf32, #tpu.memory_space<vmem>>, vector<1x32x4xf32>
      %46 = vector.shape_cast %45 : vector<1x32x4xf32> to vector<32x4xf32>
      %c0_27 = arith.constant 0 : index
      %c0_28 = arith.constant 0 : index
      %47 = vector.load %arg7[%c0_27, %c0_28] : memref<4x128xf32, #tpu.memory_space<vmem>>, vector<4x128xf32>
      %cst_29 = arith.constant dense<0.000000e+00> : vector<32x128xf32>
      %48 = tpu.matmul %46, %47, %cst_29 {dimension_numbers = #tpu.dot_dimension_numbers<[1], [0], [0], [1], [0, 0, 1, 1], [], []>} : vector<32x4xf32>, vector<4x128xf32>, vector<32x128xf32> -> vector<32x128xf32>
      %49 = arith.addf %44, %48 : vector<32x128xf32>
      %c2_30 = arith.constant 2 : index
      %c0_31 = arith.constant 0 : index
      %c0_32 = arith.constant 0 : index
      %50 = vector.load %arg3[%c2_30, %c0_31, %c0_32] : memref<4x32x4xf32, #tpu.memory_space<vmem>>, vector<1x32x4xf32>
      %51 = vector.shape_cast %50 : vector<1x32x4xf32> to vector<32x4xf32>
      %cst_33 = arith.constant dense<0.000000e+00> : vector<32x128xf32>
      %52 = tpu.matmul %51, %35, %cst_33 {dimension_numbers = #tpu.dot_dimension_numbers<[1], [0], [0], [1], [0, 0, 1, 1], [], []>} : vector<32x4xf32>, vector<4x128xf32>, vector<32x128xf32> -> vector<32x128xf32>
      %53 = arith.addf %49, %52 : vector<32x128xf32>
      %c3_34 = arith.constant 3 : index
      %c0_35 = arith.constant 0 : index
      %c0_36 = arith.constant 0 : index
      %54 = vector.load %arg3[%c3_34, %c0_35, %c0_36] : memref<4x32x4xf32, #tpu.memory_space<vmem>>, vector<1x32x4xf32>
      %55 = vector.shape_cast %54 : vector<1x32x4xf32> to vector<32x4xf32>
      %cst_37 = arith.constant dense<0.000000e+00> : vector<32x128xf32>
      %56 = tpu.matmul %55, %40, %cst_37 {dimension_numbers = #tpu.dot_dimension_numbers<[1], [0], [0], [1], [0, 0, 1, 1], [], []>} : vector<32x4xf32>, vector<4x128xf32>, vector<32x128xf32> -> vector<32x128xf32>
      %57 = arith.addf %53, %56 : vector<32x128xf32>
      %c0_38 = arith.constant 0 : index
      %c0_39 = arith.constant 0 : index
      %58 = vector.load %arg4[%c0_38, %c0_39] : memref<32x1xf32, #tpu.memory_space<vmem>>, vector<32x1xf32>
      %59 = vector.broadcast %58 : vector<32x1xf32> to vector<32x128xf32>
      %60 = arith.addf %57, %59 : vector<32x128xf32>
      %c0_40 = arith.constant 0 : index
      %c0_41 = arith.constant 0 : index
      %61 = vector.load %arg5[%c0_40, %c0_41] : memref<32x128xf32, #tpu.memory_space<vmem>>, vector<32x128xf32>
      tpu.vector_store %arg5[%c0_40, %c0_41], %60 {strides = array<i32>} : memref<32x128xf32, #tpu.memory_space<vmem>>, vector<32x128xf32>,
    } else {
    }
    return
  }
  func.func @transform_0(%arg0: i32, %arg1: i32) -> (i32, i32, i32) {
    %c0_i32 = arith.constant 0 : i32
    %c0_i32_0 = arith.constant 0 : i32
    return %arg1, %c0_i32, %arg0 : i32, i32, i32
  }
  func.func @transform_1(%arg0: i32, %arg1: i32) -> (i32, i32, i32) {
    %c0_i32 = arith.constant 0 : i32
    %c0_i32_0 = arith.constant 0 : i32
    %c0_i32_1 = arith.constant 0 : i32
    %c0_i32_2 = arith.constant 0 : i32
    return %c0_i32, %c0_i32_0, %c0_i32_1 : i32, i32, i32
  }
  func.func @transform_2(%arg0: i32, %arg1: i32) -> (i32, i32) {
    %c0_i32 = arith.constant 0 : i32
    %c0_i32_0 = arith.constant 0 : i32
    %c0_i32_1 = arith.constant 0 : i32
    return %c0_i32, %c0_i32_0 : i32, i32
  }
  func.func @transform_3(%arg0: i32, %arg1: i32) -> (i32, i32) {
    %c0_i32 = arith.constant 0 : i32
    %c0_i32_0 = arith.constant 0 : i32
    return %c0_i32, %arg0 : i32, i32
  }
}

</mosaic_0001>

<bundles_post_ra>
// kernel: tpu_custom_call.1
= control target key start
LH: loop header
LB: loop body
LE: loop exit
PB: predicated region body
PF: predicated region fallthrough
CT: control target
= control target key end

     0   :  { %vm82_vm0 = vcmask 31744   ;;  %v679_v16 = vmov 0   ;;  %s811_s0 = inlined_call_operand.vmem [shape: f32[4,4,128], index: 0, kind: input, shape index: {}]   ;;  %s812_s1 = inlined_call_operand.vmem [shape: f32[4,32,4], index: 1, kind: input, shape index: {}]   ;;  %s813_s2 = inlined_call_operand.vmem [shape: f32[32,1], index: 2, kind: input, shape index: {}]   ;;  %s814_s3 = inlined_call_operand.hbm [shape: f32[32,128], index: 3, kind: output, shape index: {}]  }
   0x1   :  { %v15_v0 = vld [vmem:[%s811_s0] sm:$0xf]  ;;  %v550_v1 = vld [vmem:[%s811_s0 + $0x4] sm:$0xf]  ;;  %v551_v2 = vld [vmem:[%s811_s0 + $0x8] sm:$0xf]  ;;  %653 = vset.pattern.permute.xlu0 %v679_v16  ;;  %654 = vset.pattern.permute.xlu1 %v679_v16 }
   0x2   :  { %v16_v3 = vmul.f32 %v15_v0, %v15_v0  ;;  %v20_v4 = vmin.f32 %v15_v0, %v550_v1  ;;  %v22_v5 = vmul.f32 %v550_v1, %v550_v1  ;;  %v29_v6 = vmul.f32 %v551_v2, %v551_v2  ;;  %v552_v7 = vld [vmem:[%s811_s0 + $0xc] sm:$0xf]  ;;  %v553_v8 = vld [vmem:[%s812_s1 + $0x20] sm:$0xff]  ;;  %v504_v24 = vld [vmem:[%s813_s2 + $0x10] sm:$0xff] }
   0x3   :  { %v36_v9 = vmul.f32 %v552_v7, %v552_v7  ;;  %v21_v10 = vadd.f32 %v550_v1, %v15_v0  ;;  %v567_v11 = vld [vmem:[%s812_s1 + $0x40] sm:$0xff]  ;;  %607 = vmatprep.mubr.msk.f32.mxu1 %vm82_vm0, %v553_v8  ;;  %v19_v13 = vmax.f32 %v15_v0, %v550_v1  ;;  %518 = vperm.xlu1 %654, %v504_v24   ;;  %v503_v25 = vld [vmem:[%s813_s2 + $0x8] sm:$0xff] }
   0x4   :  { %v27_v12 = vmin.f32 %v20_v4, %v551_v2  ;;  %623 = vmatprep.mubr.msk.f32.mxu0 %vm82_vm0, %v567_v11  ;;  %v23_v14 = vadd.f32 %v22_v5, %v16_v3  ;;  %v502_v21 = vld [vmem:[%s813_s2] sm:$0xff] }
   0x5   :  { %v28_v15 = vadd.f32 %v551_v2, %v21_v10  ;;  %v26_v18 = vmax.f32 %v19_v13, %v551_v2  ;;  %508 = vperm.xlu0 %653, %v502_v21  }
   0x6   :  { %v34_v17 = vmin.f32 %v27_v12, %v552_v7  ;;  %v30_v19 = vadd.f32 %v29_v6, %v23_v14 }
   0x7   :  { %v35_v20 = vadd.f32 %v552_v7, %v28_v15  ;;  %v33_v22 = vmax.f32 %v26_v18, %v552_v7 }
   0x8   :  { %43 = vst [vmem:[#allocation3] sm:$0xf] %v34_v17  ;;  %v37_v23 = vadd.f32 %v36_v9, %v30_v19 }
   0x9   :  { %44 = vst [vmem:[#allocation4] sm:$0xf] %v35_v20 }
   0xa   :  { %8 = vsyncpa [#allocation7], 0  ;;  %42 = vst [vmem:[#allocation2] sm:$0xf] %v33_v22  ;;  %v505_v26 = vld [vmem:[%s813_s2 + $0x18] sm:$0xff]  ;;  %513 = vperm.xlu0 %653, %v503_v25   ;;  %vm95_vm1 = vcmask 1043456  }
   0xb   :  { %45 = vst [vmem:[#allocation5] sm:$0xf] %v37_v23  ;;  %523 = vperm.xlu1 %654, %v505_v26   ;;  %v554_v28 = vld [vmem:[%s812_s1 + $0x28] sm:$0xff]  ;;  %v555_v30 = vld [vmem:[%s812_s1 + $0x30] sm:$0xff]  ;;  %v556_v36 = vld [vmem:[%s812_s1 + $0x38] sm:$0xff]  ;;  %s680_s30 = smov [#allocation6]  }
   0xc   :  { %v568_v33 = vld [vmem:[%s812_s1 + $0x48] sm:$0xff]  ;;  %v569_v37 = vld [vmem:[%s812_s1 + $0x50] sm:$0xff]  ;;  %v71_v38 = vld [vmem:[%s812_s1] sm:$0xff]  ;;  %s539_s4 = sshll.u32 %s680_s30, 4  ;;  %s540_s4 = int_to_ptr.vmem [resolvable:$true] %s539_s4 }
   0xd   :  { %v570_v40 = vld [vmem:[%s812_s1 + $0x58] sm:$0xff]  ;;  %v72_v42 = vld [vmem:[%s812_s1 + $0x8] sm:$0xff]  ;;  %v576_v43 = vld [vmem:[%s812_s1 + $0x60] sm:$0xff]  ;;  %p660_p1 = scmp.lt.s32.totalorder %s540_s4, %s540_s4 }
   0xe   :  { %v73_v44 = vld [vmem:[%s812_s1 + $0x10] sm:$0xff]  ;;  %v577_v45 = vld [vmem:[%s812_s1 + $0x68] sm:$0xff]  ;;  %v74_v46 = vld [vmem:[%s812_s1 + $0x18] sm:$0xff] }
   0xf   :  { %v81_v27 = vld [vmem:[#allocation3] sm:$0xf]  ;;  %v578_v47 = vld [vmem:[%s812_s1 + $0x70] sm:$0xff]  ;;  %v579_v48 = vld [vmem:[%s812_s1 + $0x78] sm:$0xff]  ;;  %s655_s1 = scalar_lea.vmem %s540_s4, 512 }
  0x10   :  { %605 = vmatprep.subr.msk.mxu1 %vm95_vm1, %v81_v27  ;;  %v65_v29 = vld [vmem:[#allocation4] sm:$0xf]  ;;  %p656_p0 = scmp.ne.s32.totalorder %s540_s4, %s655_s1  ;;  %p661_p2 = scmp.lt.s32.totalorder %s655_s1, %s655_s1 }
  0x11   :  { %606 = vmatpush3.msk.msra.mxu1 %vm95_vm1, %v81_v27  ;;  %v66_v31 = vmul.f32 0.25, %v65_v29  ;;  %v75_v32 = vld [vmem:[#allocation2] sm:$0xf] }
  0x12   :  { %608 = vmatmul.mubr.msk.f32.vlgmr.msra.gmra.mrb[0].mxu1 %vm82_vm0, %v554_v28  ;;  %613 = vmatprep.subr.msk.mxu1 %vm95_vm1, %v75_v32  ;;  %v67_v34 = vld [vmem:[#allocation5] sm:$0xf]  ;;  %p662_p3 = por %p661_p2, %p660_p1 }
  0x13   :  { %v68_v35 = vmul.f32 %v66_v31, %v65_v29  ;;  %621 = vmatprep.subr.msk.mxu0 %vm95_vm1, %v66_v31  ;;  %610 = vmatprep.mubr.msk.f32.mxu1 %vm82_vm0, %v555_v30 }
  0x14   :  { %622 = vmatpush3.msk.msra.mxu0 %vm95_vm1, %v66_v31  ;;  %614 = vmatpush3.msk.msra.mxu1 %vm95_vm1, %v75_v32  ;;  %p663_p4 = pnand %p662_p3, %p656_p0 }
  0x15   :  { %624 = vmatmul.mubr.msk.f32.vlgmr.msra.gmra.mrb[0].mxu0 %vm82_vm0, %v568_v33  ;;  %v69_v39 = vsub.f32 %v67_v34, %v68_v35 }
  0x16   :  { %611 = vmatmul.mubr.msk.f32.gmra.mrb[2].mxu1 %vm82_vm0, %v556_v36  ;;  %626 = vmatprep.mubr.msk.f32.mxu0 %vm82_vm0, %v569_v37 }
  0x17   :  { %v70_v41 = vmul.f32 0.33333334, %v69_v39  ;;  %615 = vmatprep.mubr.msk.f32.mxu1 %vm82_vm0, %v71_v38 }
  0x19   :  { %627 = vmatmul.mubr.msk.f32.gmra.mrb[2].mxu0 %vm82_vm0, %v570_v40  ;;  %629 = vmatprep.subr.msk.mxu0 %vm95_vm1, %v70_v41 }
  0x1a   :  { %630 = vmatpush3.msk.msra.mxu0 %vm95_vm1, %v70_v41  ;;  %616 = vmatmul.mubr.msk.f32.vlgmr.msra.gmra.mrb[0].mxu1 %vm82_vm0, %v72_v42 }
  0x1b   :  { %631 = vmatprep.mubr.msk.f32.mxu0 %vm82_vm0, %v576_v43  ;;  %618 = vmatprep.mubr.msk.f32.mxu1 %vm82_vm0, %v73_v44 }
  0x1d   :  { %632 = vmatmul.mubr.msk.f32.vlgmr.msra.gmra.mrb[0].mxu0 %vm82_vm0, %v577_v45 }
  0x1e   :  { %619 = vmatmul.mubr.msk.f32.gmra.mrb[2].mxu1 %vm82_vm0, %v74_v46  ;;  %634 = vmatprep.mubr.msk.f32.mxu0 %vm82_vm0, %v578_v47 }
  0x21   :  { %635 = vmatmul.mubr.msk.f32.gmra.mrb[2].mxu0 %vm82_vm0, %v579_v48 }
  0x82   :  { %v519_v52 = vpop.permute.xlu1 %518 }
  0x84   :  { %v509_v49 = vpop.permute.xlu0 %508 }
  0x89   :  { %v514_v54 = vpop.permute.xlu0 %513 }
  0x8a   :  { %v524_v2 = vpop.permute.xlu1 %523 }
  0xed   :  { %v617_v50 = vpop.f32.mrb[0].mxu1 }
  0xee   :  { %v265_v51 = vpop.f32.mrb[1].mxu1 }
  0xf0   :  { %v633_v53 = vpop.f32.mrb[0].mxu0 }
  0xf1   :  { %v637_v55 = vadd.f32 %v633_v53, %v617_v50  ;;  %v479_v56 = vpop.f32.mrb[1].mxu0  ;;  %v620_v57 = vpop.f32.mrb[2].mxu1 }
  0xf2   :  { %v638_v58 = vadd.f32 %v479_v56, %v265_v51  ;;  %v275_v59 = vpop.f32.mrb[3].mxu1 }
  0xf3   :  { %v527_v60 = vadd.f32 %v637_v55, %v514_v54 }
  0xf4   :  { %v526_v61 = vadd.f32 %v638_v58, %v509_v49  ;;  %v636_v62 = vpop.f32.mrb[2].mxu0 }
  0xf5   :  { %531 = vst [vmem:[#allocation6 + $0x8] sm:$0xff] %v527_v60  ;;  %v639_v63 = vadd.f32 %v636_v62, %v620_v57  ;;  %v489_v0 = vpop.f32.mrb[3].mxu0 }
  0xf6   :  { %530 = vst [vmem:[#allocation6] sm:$0xff] %v526_v61  ;;  %v640_v1 = vadd.f32 %v489_v0, %v275_v59 }
  0xf7   :  { %v529_v3 = vadd.f32 %v639_v63, %v524_v2 }
  0xf8   :  { %v528_v4 = vadd.f32 %v640_v1, %v519_v52 }
  0xf9   :  { %533 = vst [vmem:[#allocation6 + $0x18] sm:$0xff] %v529_v3 }
  0xfa   :  { %532 = vst [vmem:[#allocation6 + $0x10] sm:$0xff] %v528_v4 }
  0xfb   :  { %666 = shalt.err (!%p663_p4)
}
  0xfc   :  { %s667_s7 = scalar_lea.hbm %s814_s3, 512 }
  0xfd   :  { %p668_p5 = scmp.ne.s32.totalorder %s814_s3, %s667_s7  ;;  %p671_p6 = scmp.lt.u32.totalorder %s667_s7, %s814_s3 }
  0xff   :  { %p673_p7 = pnand %p671_p6, %p668_p5 }
 0x101   :  { %676 = shalt.err (!%p673_p7)
}
 0x102   :  { %s681_s11 = smov 128   ;;  %s682_s12 = smov 8  }
 0x103   :  { %545 = dma.vmem_to_hbm [thread:$0]  %s540_s4, 512, %s814_s3, [#allocation7], %s681_s11, %s681_s11, %s682_s12  }
 0x104   :  { %677 = dma.done.wait [#allocation7], 512  }
 0x105   :  { %678 = vsyncadd [#allocation7], 4294966784 }
 0x106   :  { %549 = vsyncpa [#allocation7], 1 }

</bundles_post_ra>
